<compile_context>
chip_gen: v6e
topology: v6e:2x2x1
jax: 0.10.0
libtpu: 0.0.40
codegen_flags: <defaults>
</compile_context>

<pallas_src>
import jax
import jax.numpy as jnp
from jax.experimental import pallas as pl
from jax.experimental.pallas import tpu as pltpu


_LANES = 128
_SUBLANES = 8
_ALIGN = _LANES * _SUBLANES              # 1024-element base alignment
_FUSED_MAX_ELEMS = 1 * 1024 * 1024       # <= 4 MiB of f32 work -> fused path
_MAX_TILE_ROWS = 512                     # (512, 128) f32 tile = 256 KiB
_MIN_GOOD_TILE_ROWS = 256                # below this, repad for a big tile


# ----------------------------------------------------------------------------
# Fast path: whole (padded) tensor as a single VMEM-resident block.
# ----------------------------------------------------------------------------
def _fused_softmax_kernel(x_ref, out_ref):
    e = jnp.exp(x_ref[...].astype(jnp.float32))
    inv = 1.0 / jnp.sum(e)                 # one scalar divide for everything
    out_ref[...] = (e * inv).astype(out_ref.dtype)


# ----------------------------------------------------------------------------
# Two-pass path (large tensors).
# Pass 1: accumulate sum(exp(x)) over large row tiles; emit 1/sum (SMEM).
# ----------------------------------------------------------------------------
def _sum_exp_kernel(x_ref, inv_ref, acc_ref):
    i = pl.program_id(0)

    @pl.when(i == 0)
    def _():
        acc_ref[...] = jnp.zeros_like(acc_ref)

    e = jnp.exp(x_ref[...].astype(jnp.float32))
    # Per-step sublane reduce only; the full cross-lane reduce + divide
    # happens once, on the last grid step.
    acc_ref[...] += jnp.sum(e, axis=0, keepdims=True)

    @pl.when(i == pl.num_programs(0) - 1)
    def _():
        inv_ref[0, 0] = 1.0 / jnp.sum(acc_ref[...])


# Pass 2: re-read x, recompute exp (no HBM intermediate) and scale by 1/sum.
def _scale_exp_kernel(x_ref, inv_ref, out_ref):
    e = jnp.exp(x_ref[...].astype(jnp.float32))
    out_ref[...] = (e * inv_ref[0, 0]).astype(out_ref.dtype)


def _largest_tile_rows(rows, cap):
    """Largest multiple of 8 that divides `rows` and is <= cap."""
    start = cap - (cap % _SUBLANES)
    for cand in range(start, _SUBLANES - 1, -_SUBLANES):
        if rows % cand == 0:
            return cand
    return _SUBLANES


def my_softmax(x):
    """Pallas implementation of exp(x) / sum(exp(x)) (global scalar sum)."""
    orig_shape = x.shape
    orig_dtype = x.dtype
    total = x.size

    # ---- static (Python-level) padding / tiling decisions -----------------
    padded = total + ((-total) % _ALIGN)
    rows = padded // _LANES                      # multiple of 8
    fused = padded <= _FUSED_MAX_ELEMS
    if fused:
        tile_r = rows
    else:
        tile_r = _largest_tile_rows(rows, _MAX_TILE_ROWS)
        if tile_r < _MIN_GOOD_TILE_ROWS:
            # Awkward factorization: pad further so a full-size tile divides.
            tile_r = _MAX_TILE_ROWS
            padded = total + ((-total) % (tile_r * _LANES))
            rows = padded // _LANES
    pad = padded - total

    flat = x.reshape(-1)
    if pad:
        # exp(-inf) == 0, so padded elements do not perturb the global sum.
        flat = jnp.concatenate(
            [flat, jnp.full((pad,), -jnp.inf, dtype=flat.dtype)]
        )
    x2d = flat.reshape(rows, _LANES)             # native dtype; upcast in-kernel

    if fused:
        # --- single-kernel fused path --------------------------------------
        out2d = pl.pallas_call(
            _fused_softmax_kernel,
            out_shape=jax.ShapeDtypeStruct((rows, _LANES), orig_dtype),
            grid_spec=pltpu.PrefetchScalarGridSpec(
                num_scalar_prefetch=0,
                grid=(1,),
                in_specs=[pl.BlockSpec((rows, _LANES), lambda i: (0, 0))],
                out_specs=pl.BlockSpec((rows, _LANES), lambda i: (0, 0)),
            ),
            compiler_params=pltpu.CompilerParams(
                dimension_semantics=("arbitrary",),
                vmem_limit_bytes=32 * 1024 * 1024,
            ),
        )(x2d)
    else:
        # --- two-pass path with large tiles --------------------------------
        grid = (rows // tile_r,)

        # Pass 1: global reduction -> scalar 1/sum in SMEM.
        # TODO(synk): on v7x, split this reduction across the 2 TensorCores
        # (per-core partial sums) instead of a single sequential accumulator.
        inv_sum = pl.pallas_call(
            _sum_exp_kernel,
            out_shape=jax.ShapeDtypeStruct((1, 1), jnp.float32),
            grid_spec=pltpu.PrefetchScalarGridSpec(
                num_scalar_prefetch=0,
                grid=grid,
                in_specs=[pl.BlockSpec((tile_r, _LANES), lambda i: (i, 0))],
                out_specs=pl.BlockSpec(memory_space=pltpu.MemorySpace.SMEM),
                scratch_shapes=[pltpu.VMEM((1, _LANES), jnp.float32)],
            ),
            compiler_params=pltpu.CompilerParams(
                dimension_semantics=("arbitrary",),
                vmem_limit_bytes=32 * 1024 * 1024,
            ),
        )(x2d)

        # Pass 2: elementwise exp(x) * (1/sum), fully parallel over tiles.
        out2d = pl.pallas_call(
            _scale_exp_kernel,
            out_shape=jax.ShapeDtypeStruct((rows, _LANES), orig_dtype),
            grid_spec=pltpu.PrefetchScalarGridSpec(
                num_scalar_prefetch=0,
                grid=grid,
                in_specs=[
                    pl.BlockSpec((tile_r, _LANES), lambda i: (i, 0)),
                    pl.BlockSpec(memory_space=pltpu.MemorySpace.SMEM),
                ],
                out_specs=pl.BlockSpec((tile_r, _LANES), lambda i: (i, 0)),
            ),
            compiler_params=pltpu.CompilerParams(
                dimension_semantics=("parallel",),
                vmem_limit_bytes=32 * 1024 * 1024,
            ),
        )(x2d, inv_sum)

    if pad:
        return out2d.reshape(-1)[:total].reshape(orig_shape)
    return out2d.reshape(orig_shape)


if __name__ == "__main__":
    key = jax.random.PRNGKey(0)
    # NCHW input, small shapes: batch=2, channels=4, spatial=16x16.
    x = jax.random.normal(key, (2, 4, 16, 16), dtype=jnp.float32)

    out = jax.block_until_ready(my_softmax(x))

    # Reference check against plain JAX (same semantics as the torch module:
    # no max-subtraction, single global denominator).
    ref = jnp.exp(x) / jnp.sum(jnp.exp(x))
    assert out.shape == x.shape and out.dtype == x.dtype
    assert jnp.allclose(out, ref, rtol=1e-5, atol=1e-6)

    print("KERNEL_OK")
</pallas_src>

<mosaic_0001>
module attributes {stable_mosaic.version = 11 : i64} {
  func.func @_fused_softmax_kernel(%arg0: i32, %arg1: memref<16x128xf32, #tpu.memory_space<vmem>>, %arg2: memref<16x128xf32, #tpu.memory_space<vmem>>) attributes {dimension_semantics = [#tpu.dimension_semantics<arbitrary>], iteration_bounds = array<i64: 1>, scalar_prefetch = 0 : i64, scratch_operands = 0 : i64, tpu.core_type = #tpu.core_type<tc>, window_params = [{pipeline_mode = #tpu.pipeline_mode<synchronous>, transform_indices = @transform_0, window_bounds = array<i64: 16, 128>}, {pipeline_mode = #tpu.pipeline_mode<synchronous>, transform_indices = @transform_1, window_bounds = array<i64: 16, 128>}]} {
    %c0 = arith.constant 0 : index
    %c0_0 = arith.constant 0 : index
    %0 = vector.load %arg1[%c0, %c0_0] : memref<16x128xf32, #tpu.memory_space<vmem>>, vector<16x128xf32>
    %1 = math.exp %0 : vector<16x128xf32>
    %2 = vector.shape_cast %1 : vector<16x128xf32> to vector<1x16x128xf32>
    %cst = arith.constant dense<0.000000e+00> : vector<1xf32>
    %3 = vector.multi_reduction <add>, %2, %cst [1, 2] : vector<1x16x128xf32> to vector<1xf32>
    %4 = vector.shape_cast %3 : vector<1xf32> to vector<1x1x1xf32>
    %5 = vector.extract %4[0, 0, 0] : f32 from vector<1x1x1xf32>
    %cst_1 = arith.constant 1.000000e+00 : f32
    %6 = arith.divf %cst_1, %5 : f32
    %7 = vector.broadcast %6 : f32 to vector<16x128xf32>
    %8 = arith.mulf %1, %7 : vector<16x128xf32>
    %c0_2 = arith.constant 0 : index
    %c0_3 = arith.constant 0 : index
    %9 = vector.load %arg2[%c0_2, %c0_3] : memref<16x128xf32, #tpu.memory_space<vmem>>, vector<16x128xf32>
    tpu.vector_store %arg2[%c0_2, %c0_3], %8 {strides = array<i32>} : memref<16x128xf32, #tpu.memory_space<vmem>>, vector<16x128xf32>,
    return
  }
  func.func @transform_0(%arg0: i32) -> (i32, i32) {
    %c0_i32 = arith.constant 0 : i32
    %c0_i32_0 = arith.constant 0 : i32
    %c0_i32_1 = arith.constant 0 : i32
    return %c0_i32, %c0_i32_0 : i32, i32
  }
  func.func @transform_1(%arg0: i32) -> (i32, i32) {
    %c0_i32 = arith.constant 0 : i32
    %c0_i32_0 = arith.constant 0 : i32
    %c0_i32_1 = arith.constant 0 : i32
    return %c0_i32, %c0_i32_0 : i32, i32
  }
}

</mosaic_0001>

<bundles_post_ra>
// kernel: tpu_custom_call.1
= control target key start
LH: loop header
LB: loop body
LE: loop exit
PB: predicated region body
PF: predicated region fallthrough
CT: control target
= control target key end

     0   :  { %6 = vsyncpa [#allocation3], 0  ;;  %s148_s0 = inlined_call_operand.hbm [shape: f32[16,128], index: 0, kind: input, shape index: {}]   ;;  %s149_s1 = inlined_call_operand.hbm [shape: f32[16,128], index: 1, kind: output, shape index: {}]  }
   0x1   :  { %7 = vsyncpa [#allocation4], 0  ;;  %s122_s6 = smov [#allocation2]  }
   0x2   :  { %s13_s7 = sshll.u32 %s122_s6, 4  ;;  %s14_s7 = int_to_ptr.vmem [resolvable:$true] %s13_s7 }
   0x3   :  { %s86_s8 = scalar_lea.vmem %s14_s7, 256  ;;  %p91_p1 = scmp.lt.s32.totalorder %s14_s7, %s14_s7 }
   0x4   :  { %p87_p0 = scmp.ne.s32.totalorder %s14_s7, %s86_s8  ;;  %p92_p2 = scmp.lt.s32.totalorder %s86_s8, %s86_s8 }
   0x6   :  { %p93_p3 = por %p92_p2, %p91_p1 }
   0x8   :  { %p94_p4 = pnand %p93_p3, %p87_p0 }
   0xa   :  { %97 = shalt.err (!%p94_p4)
}
   0xb   :  { %s123_s9 = smov 128   ;;  %s124_s10 = smov 8  }
   0xc   :  { %19 = dma.hbm_to_vmem [thread:$0]  %s148_s0, 256, %s14_s7, [#allocation3], %s123_s9, %s123_s9, %s124_s10  }
   0xd   :  { %118 = dma.done.wait [#allocation3], 256  }
   0xe   :  { %119 = vsyncadd [#allocation3], 4294967040  ;;  %v23_v0 = vld [vmem:[#allocation2] sm:$0xff]  ;;  %v24_v1 = vld [vmem:[#allocation2 + $0x8] sm:$0xff]  ;;  %s125_s13 = smov [#allocation5]  }
   0xf   :  { %v25_v2 = vmul.f32 1.442695, %v23_v0  ;;  %v27_v3 = vmul.f32 1.442695, %v24_v1  ;;  %s52_s14 = sshll.u32 %s125_s13, 4  ;;  %s53_s14 = int_to_ptr.vmem [resolvable:$true] %s52_s14 }
  0x10   :  { %s98_s16 = scalar_lea.vmem %s53_s14, 256  ;;  %p103_p6 = scmp.lt.s32.totalorder %s53_s14, %s53_s14 }
  0x11   :  { %72 = vpow2.f32 %v25_v2  ;;  %p99_p5 = scmp.ne.s32.totalorder %s53_s14, %s98_s16  ;;  %p104_p7 = scmp.lt.s32.totalorder %s98_s16, %s98_s16 }
  0x12   :  { %74 = vpow2.f32 %v27_v3 }
  0x13   :  { %p105_p8 = por %p104_p7, %p103_p6 }
  0x15   :  { %p106_p9 = pnand %p105_p8, %p99_p5 }
  0x1e   :  { %v73_v4 = vpop.eup %72 }
  0x1f   :  { %v75_v5 = vpop.eup %74 }
  0x20   :  { %v29_v6 = vadd.f32 %v75_v5, %v73_v4 }
  0x22   :  { %30 = vadd.xlane.f32.xlu0 %v29_v6 }
  0xab   :  { %v31_v7 = vpop.xlane.xlu0 %30 }
  0xac   :  { %v32_v8 = vrot.slane %v31_v7, 4 }
  0xae   :  { %v33_v9 = vadd.f32 %v32_v8, %v31_v7 }
  0xb0   :  { %v34_v10 = vrot.slane %v33_v9, 2 }
  0xb2   :  { %v35_v11 = vadd.f32 %v34_v10, %v33_v9 }
  0xb4   :  { %v36_v12 = vrot.slane %v35_v11, 1 }
  0xb6   :  { %v37_v13 = vadd.f32 %v36_v12, %v35_v11 }
  0xb8   :  { %64 = vpush %v37_v13 }
  0xe9   :  { %s65_s0 = spop %64 }
  0xea   :  { %v39_v14 = vstv %s65_s0 }
  0xeb   :  { %76 = vrcp.f32 %v39_v14 }
  0xf8   :  { %v77_v15 = vpop.eup %76 }
  0xf9   :  { %66 = vpush %v77_v15 }
 0x12a   :  { %s67_s15 = spop %66 }
 0x12b   :  { %v42_v16 = vstv %s67_s15 }
 0x12c   :  { %v43_v17 = vmul.f32 %v73_v4, %v42_v16  ;;  %v44_v18 = vmul.f32 %v75_v5, %v42_v16 }
 0x12e   :  { %45 = vst [vmem:[#allocation5] sm:$0xff] %v43_v17  ;;  %46 = vst [vmem:[#allocation5 + $0x8] sm:$0xff] %v44_v18 }
 0x12f   :  { %109 = shalt.err (!%p106_p9)
}
 0x130   :  { %58 = dma.vmem_to_hbm [thread:$0]  %s53_s14, 256, %s149_s1, [#allocation4], %s123_s9, %s123_s9, %s124_s10  }
 0x131   :  { %120 = dma.done.wait [#allocation4], 256  }
 0x132   :  { %121 = vsyncadd [#allocation4], 4294967040 }
 0x133   :  { %62 = vsyncpa [#allocation3], 1 }
 0x134   :  { %63 = vsyncpa [#allocation4], 1 }

</bundles_post_ra>
